<compile_context>
chip_gen: v7x
topology: tpu7x:2x2x1
jax: 0.10.0
libtpu: 0.0.40
codegen_flags: <defaults>
</compile_context>

<pallas_src>
import functools
import math

import jax
import jax.numpy as jnp
from jax import lax
from jax.experimental import pallas as pl
from jax.experimental.pallas import tpu as pltpu

# buffers from __init__ (deterministic, as in the PyTorch module defaults)
TEMPERATURE = 0.2    # IntraModalLoss.temperature (both modalities)
HYPER_GAMMA = 0.5    # IntraModalLoss.hyper_gamma
HYPER_LAMBDA = 0.5   # TotalIntraModalLoss.hyper_lambda

# Analytic softplus constants for the (unit) diagonal of the normalized Gram
# matrix: diag(z z^T) == 1 after F.normalize.
_POS_DIAG = math.log1p(math.exp(TEMPERATURE - 1.0))   # softplus(T - 1)
_NEG_DIAG = math.log1p(math.exp(1.0 - TEMPERATURE))   # softplus(1 - T)


def _intra_modal_kernel(ri_ref, ci_ref, row_ref, col_ref, out_ref, acc_ref, *,
                        batch_size, acc_rows):
    s = pl.program_id(1)          # triangular-schedule step (reduction axis)
    ns = pl.num_programs(1)
    i = ri_ref[s]                 # row-tile block index
    j = ci_ref[s]                 # col-tile block index (j >= i)

    @pl.when(s == 0)
    def _():
        acc_ref[...] = jnp.zeros_like(acc_ref)

    zr = row_ref[...]             # (tile, D), pre-normalized (f32 or bf16)
    zc = col_ref[...]             # (tile, D)

    # sim tile = zr @ zc.T, contracting the last (lane) axis of both operands
    # directly on the MXU — no transposed copy materialized.
    sim = lax.dot_general(
        zr, zc, dimension_numbers=(((1,), (1,)), ((), ())),
        preferred_element_type=jnp.float32)            # (tile, tile)

    softp = jnp.log1p(jnp.exp(sim - TEMPERATURE))      # softplus(sim - T)

    # Reduce (tile, tile) -> (acc_rows, tile) with pure VPU adds (no per-step
    # cross-lane reduce, no scalar SMEM round-trip).
    tile = softp.shape[0]
    partial = softp[0:acc_rows, :]
    for k in range(1, tile // acc_rows):
        partial = partial + softp[k * acc_rows:(k + 1) * acc_rows, :]

    # Off-diagonal tile pairs appear twice in the full B x B sum (symmetry of
    # z z^T); diagonal tiles appear once.
    weight = jnp.where(i == j, jnp.float32(1.0), jnp.float32(2.0))
    acc_ref[...] += weight * partial

    @pl.when(s == ns - 1)
    def _():
        b = jnp.float32(batch_size)
        # Single cross-lane reduce at finalize; remove the diagonal entries
        # (counted once, inside the i == j tiles) analytically.
        neg_sum = jnp.sum(acc_ref[...]) - b * jnp.float32(_NEG_DIAG)
        pos_sum = b * jnp.float32(_POS_DIAG)
        loss = (HYPER_GAMMA * pos_sum / b
                + (1.0 - HYPER_GAMMA) * neg_sum / (b * (b - 1.0)))
        out_ref[...] = jnp.full(out_ref.shape, loss, dtype=jnp.float32)


def _vmem_capacity_bytes():
    try:
        return int(pltpu.get_tpu_info().vmem_capacity_bytes)
    except Exception:
        return 64 * 1024 * 1024    # v7x floor — conservative fallback


def _pick_tile(batch, hidden, itemsize, vmem_budget):
    """Largest square tile dividing batch whose pipeline buffers + temporaries
    fit the VMEM budget (square tiles are required by the symmetric schedule)."""
    for t in (1024, 512, 256, 128):
        if batch % t:
            continue
        pipeline = 2 * 2 * t * hidden * itemsize   # row+col, double-buffered
        temps = 6 * t * t * 4                      # sim / softplus / partials (f32)
        if pipeline + temps <= vmem_budget:
            return t
    return batch   # small / ragged batch: full extent


def total_intra_modal_loss(emb_i, emb_j, *, use_bf16_matmul=False, tile=None):
    assert emb_i.shape == emb_j.shape and emb_i.ndim == 2
    batch, hidden = emb_i.shape
    assert batch >= 2, "B*(B-1) denominator requires batch_size >= 2"

    # Pre-normalize ONCE (F.normalize(x, dim=1), eps=1e-12) fused with the
    # modality stack; the kernel then only does matmul + softplus + reduce.
    stacked = jnp.stack([emb_i, emb_j], axis=0).astype(jnp.float32)   # (2, B, D)
    sq = jnp.sum(stacked * stacked, axis=-1, keepdims=True)
    z = stacked * lax.rsqrt(jnp.maximum(sq, 1e-24))
    if use_bf16_matmul:
        z = z.astype(jnp.bfloat16)   # bf16 in HBM: halves DMA bytes + buffers

    itemsize = 2 if use_bf16_matmul else 4
    cap = _vmem_capacity_bytes()
    if tile is None:
        tile = _pick_tile(batch, hidden, itemsize, int(0.4 * cap))
    assert batch % tile == 0
    nb = batch // tile
    acc_rows = 8 if tile % 8 == 0 else 1

    # Upper-triangular tile schedule (row-major: row block stays resident).
    pairs = [(i, j) for i in range(nb) for j in range(i, nb)]
    row_idx = jnp.asarray([p[0] for p in pairs], dtype=jnp.int32)
    col_idx = jnp.asarray([p[1] for p in pairs], dtype=jnp.int32)
    n_steps = len(pairs)

    kernel = functools.partial(_intra_modal_kernel,
                               batch_size=batch, acc_rows=acc_rows)

    row_spec = pl.BlockSpec((pl.Squeezed(), tile, hidden),
                            lambda m, s, ri, ci: (m, ri[s], 0))
    col_spec = pl.BlockSpec((pl.Squeezed(), tile, hidden),
                            lambda m, s, ri, ci: (m, ci[s], 0))
    # Lane-dense (8,128) per-modality output tile; per-modality loss at [m,0,0].
    out_spec = pl.BlockSpec((1, 8, 128), lambda m, s, ri, ci: (m, 0, 0))

    needed = (2 * 2 * tile * hidden * itemsize      # double-buffered operands
              + 6 * tile * tile * 4                 # sim/softplus temporaries
              + acc_rows * tile * 4 + 2 * 8 * 128 * 4)
    vmem_limit = int(min(0.9 * cap, max(32 << 20, 2 * needed)))

    out = pl.pallas_call(
        kernel,
        out_shape=jax.ShapeDtypeStruct((2, 8, 128), jnp.float32),
        grid_spec=pltpu.PrefetchScalarGridSpec(
            num_scalar_prefetch=2,
            grid=(2, n_steps),
            in_specs=[row_spec, col_spec],
            out_specs=out_spec,
            scratch_shapes=[pltpu.VMEM((acc_rows, tile), jnp.float32)]),
        compiler_params=pltpu.CompilerParams(
            # Only the modality axis may be parallel: the triangular step axis
            # shares the VMEM accumulator.
            dimension_semantics=("parallel", "arbitrary"),
            vmem_limit_bytes=vmem_limit),
    )(row_idx, col_idx, z, z)

    loss_i = out[0, 0, 0]
    loss_j = out[1, 0, 0]
    return HYPER_LAMBDA * loss_i + (1.0 - HYPER_LAMBDA) * loss_j


def _reference_loss(emb_i, emb_j):
    """Pure-JAX reference mirroring the PyTorch forward."""
    def intra(emb):
        b = emb.shape[0]
        z = emb / jnp.maximum(jnp.linalg.norm(emb, axis=1, keepdims=True), 1e-12)
        sim = z @ z.T
        diag = jnp.diagonal(sim)
        mask = 1.0 - jnp.eye(b, dtype=jnp.float32)
        pos = jnp.log1p(jnp.exp(-diag + TEMPERATURE))
        neg = jnp.log1p(mask * jnp.exp(sim - TEMPERATURE))
        return (HYPER_GAMMA * jnp.sum(pos) / b
                + (1.0 - HYPER_GAMMA) * jnp.sum(neg) / (b * (b - 1)))
    return HYPER_LAMBDA * intra(emb_i) + (1.0 - HYPER_LAMBDA) * intra(emb_j)


if __name__ == "__main__":
    key = jax.random.PRNGKey(0)
    ki, kj = jax.random.split(key)

    # Small shapes consistent with the module: (batch, hidden).
    batch, hidden = 8, 32
    emb_i = jax.random.normal(ki, (batch, hidden), dtype=jnp.float32)
    emb_j = jax.random.normal(kj, (batch, hidden), dtype=jnp.float32)

    ref = jax.block_until_ready(_reference_loss(emb_i, emb_j))

    # f32 MXU path: bit-close to the f32 PyTorch reference.
    loss_f32 = jax.block_until_ready(total_intra_modal_loss(emb_i, emb_j))
    assert jnp.allclose(loss_f32, ref, rtol=1e-5, atol=1e-5), (loss_f32, ref)

    # bf16-operand-in-HBM path (v5e/v6e/v7x throughput option): looser tolerance.
    loss_bf16 = jax.block_until_ready(
        total_intra_modal_loss(emb_i, emb_j, use_bf16_matmul=True))
    assert jnp.allclose(loss_bf16, ref, rtol=3e-2, atol=3e-2), (loss_bf16, ref)

    # Exercise the triangular multi-tile schedule (symmetry doubling, scalar
    # prefetch index maps, row-block reuse) with a forced small tile.
    batch2 = 32
    k2i, k2j = jax.random.split(jax.random.PRNGKey(0))
    e2i = jax.random.normal(k2i, (batch2, hidden), dtype=jnp.float32)
    e2j = jax.random.normal(k2j, (batch2, hidden), dtype=jnp.float32)
    ref2 = jax.block_until_ready(_reference_loss(e2i, e2j))
    out2 = jax.block_until_ready(total_intra_modal_loss(e2i, e2j, tile=8))
    assert jnp.allclose(out2, ref2, rtol=1e-5, atol=1e-5), (out2, ref2)

    print("KERNEL_OK")
</pallas_src>

<mosaic_0001>
module attributes {stable_mosaic.version = 11 : i64} {
  func.func @_intra_modal_kernel(%arg0: i32, %arg1: i32, %arg2: memref<1xi32, #tpu.memory_space<smem>>, %arg3: memref<1xi32, #tpu.memory_space<smem>>, %arg4: memref<1x8x32xf32, #tpu.memory_space<vmem>>, %arg5: memref<1x8x32xf32, #tpu.memory_space<vmem>>, %arg6: memref<1x8x128xf32, #tpu.memory_space<vmem>>, %arg7: memref<8x8xf32, #tpu.memory_space<vmem>>) attributes {dimension_semantics = [#tpu.dimension_semantics<parallel>, #tpu.dimension_semantics<arbitrary>], iteration_bounds = array<i64: 2, 1>, scalar_prefetch = 2 : i64, scratch_operands = 1 : i64, tpu.core_type = #tpu.core_type<tc>, window_params = [{transform_indices = @transform_0, window_bounds = array<i64: 1, 8, 32>}, {transform_indices = @transform_1, window_bounds = array<i64: 1, 8, 32>}, {transform_indices = @transform_2, window_bounds = array<i64: 1, 8, 128>}]} {
    %0 = arith.index_cast %arg1 : i32 to index
    %1 = memref.load %arg2[%0] : memref<1xi32, #tpu.memory_space<smem>>
    %2 = arith.index_cast %arg1 : i32 to index
    %3 = memref.load %arg3[%2] : memref<1xi32, #tpu.memory_space<smem>>
    %c0_i32 = arith.constant 0 : i32
    %4 = arith.cmpi eq, %arg1, %c0_i32 : i32
    %5 = arith.extui %4 : i1 to i32
    %c0_i32_0 = arith.constant 0 : i32
    %6 = arith.cmpi ne, %5, %c0_i32_0 : i32
    scf.if %6 {
      %cst_15 = arith.constant 0.000000e+00 : f32
      %26 = vector.broadcast %cst_15 : f32 to vector<8x8xf32>
      %c0_16 = arith.constant 0 : index
      %c0_17 = arith.constant 0 : index
      %27 = vector.load %arg7[%c0_16, %c0_17] : memref<8x8xf32, #tpu.memory_space<vmem>>, vector<8x8xf32>
      tpu.vector_store %arg7[%c0_16, %c0_17], %26 {strides = array<i32>} : memref<8x8xf32, #tpu.memory_space<vmem>>, vector<8x8xf32>,
    } else {
    }
    %c0 = arith.constant 0 : index
    %c0_1 = arith.constant 0 : index
    %c0_2 = arith.constant 0 : index
    %7 = vector.load %arg4[%c0, %c0_1, %c0_2] : memref<1x8x32xf32, #tpu.memory_space<vmem>>, vector<1x8x32xf32>
    %8 = vector.shape_cast %7 : vector<1x8x32xf32> to vector<8x32xf32>
    %c0_3 = arith.constant 0 : index
    %c0_4 = arith.constant 0 : index
    %c0_5 = arith.constant 0 : index
    %9 = vector.load %arg5[%c0_3, %c0_4, %c0_5] : memref<1x8x32xf32, #tpu.memory_space<vmem>>, vector<1x8x32xf32>
    %10 = vector.shape_cast %9 : vector<1x8x32xf32> to vector<8x32xf32>
    %cst = arith.constant dense<0.000000e+00> : vector<8x8xf32>
    %11 = tpu.matmul %8, %10, %cst {dimension_numbers = #tpu.dot_dimension_numbers<[1], [1], [0], [0], [0, 0, 1, 0], [], []>} : vector<8x32xf32>, vector<8x32xf32>, vector<8x8xf32> -> vector<8x8xf32>
    %cst_6 = arith.constant 2.000000e-01 : f32
    %12 = vector.broadcast %cst_6 : f32 to vector<8x8xf32>
    %13 = arith.subf %11, %12 : vector<8x8xf32>
    %14 = math.exp %13 : vector<8x8xf32>
    %15 = math.log1p %14 : vector<8x8xf32>
    %16 = arith.cmpi eq, %1, %3 : i32
    %cst_7 = arith.constant 1.000000e+00 : f32
    %cst_8 = arith.constant 2.000000e+00 : f32
    %17 = arith.select %16, %cst_7, %cst_8 : f32
    %c0_9 = arith.constant 0 : index
    %c0_10 = arith.constant 0 : index
    %18 = vector.load %arg7[%c0_9, %c0_10] : memref<8x8xf32, #tpu.memory_space<vmem>>, vector<8x8xf32>
    %19 = vector.broadcast %17 : f32 to vector<8x8xf32>
    %20 = arith.mulf %19, %15 : vector<8x8xf32>
    %21 = arith.addf %18, %20 : vector<8x8xf32>
    %c0_11 = arith.constant 0 : index
    %c0_12 = arith.constant 0 : index
    %22 = vector.load %arg7[%c0_11, %c0_12] : memref<8x8xf32, #tpu.memory_space<vmem>>, vector<8x8xf32>
    tpu.vector_store %arg7[%c0_11, %c0_12], %21 {strides = array<i32>} : memref<8x8xf32, #tpu.memory_space<vmem>>, vector<8x8xf32>,
    %c0_i32_13 = arith.constant 0 : i32
    %23 = arith.cmpi eq, %arg1, %c0_i32_13 : i32
    %24 = arith.extui %23 : i1 to i32
    %c0_i32_14 = arith.constant 0 : i32
    %25 = arith.cmpi ne, %24, %c0_i32_14 : i32
    scf.if %25 {
      %c0_15 = arith.constant 0 : index
      %c0_16 = arith.constant 0 : index
      %26 = vector.load %arg7[%c0_15, %c0_16] : memref<8x8xf32, #tpu.memory_space<vmem>>, vector<8x8xf32>
      %27 = vector.shape_cast %26 : vector<8x8xf32> to vector<1x8x8xf32>
      %cst_17 = arith.constant dense<0.000000e+00> : vector<1xf32>
      %28 = vector.multi_reduction <add>, %27, %cst_17 [1, 2] : vector<1x8x8xf32> to vector<1xf32>
      %29 = vector.shape_cast %28 : vector<1xf32> to vector<1x1x1xf32>
      %30 = vector.extract %29[0, 0, 0] : f32 from vector<1x1x1xf32>
      %cst_18 = arith.constant 8.000000e+00 : f32
      %cst_19 = arith.constant 1.17110062 : f32
      %31 = arith.mulf %cst_18, %cst_19 : f32
      %32 = arith.subf %30, %31 : f32
      %cst_20 = arith.constant 8.000000e+00 : f32
      %cst_21 = arith.constant 0.371100664 : f32
      %33 = arith.mulf %cst_20, %cst_21 : f32
      %cst_22 = arith.constant 5.000000e-01 : f32
      %34 = arith.mulf %cst_22, %33 : f32
      %cst_23 = arith.constant 8.000000e+00 : f32
      %35 = arith.divf %34, %cst_23 : f32
      %cst_24 = arith.constant 5.000000e-01 : f32
      %36 = arith.mulf %cst_24, %32 : f32
      %cst_25 = arith.constant 8.000000e+00 : f32
      %cst_26 = arith.constant 1.000000e+00 : f32
      %37 = arith.subf %cst_25, %cst_26 : f32
      %cst_27 = arith.constant 8.000000e+00 : f32
      %38 = arith.mulf %cst_27, %37 : f32
      %39 = arith.divf %36, %38 : f32
      %40 = arith.addf %35, %39 : f32
      %41 = vector.broadcast %40 : f32 to vector<1x8x128xf32>
      %c0_28 = arith.constant 0 : index
      %c0_29 = arith.constant 0 : index
      %c0_30 = arith.constant 0 : index
      %42 = vector.load %arg6[%c0_28, %c0_29, %c0_30] : memref<1x8x128xf32, #tpu.memory_space<vmem>>, vector<1x8x128xf32>
      tpu.vector_store %arg6[%c0_28, %c0_29, %c0_30], %41 {strides = array<i32>} : memref<1x8x128xf32, #tpu.memory_space<vmem>>, vector<1x8x128xf32>,
    } else {
    }
    return
  }
  func.func @transform_0(%arg0: i32, %arg1: i32, %arg2: memref<1xi32, #tpu.memory_space<smem>>, %arg3: memref<1xi32, #tpu.memory_space<smem>>) -> (i32, i32, i32) {
    %0 = arith.index_cast %arg1 : i32 to index
    %1 = memref.load %arg2[%0] : memref<1xi32, #tpu.memory_space<smem>>
    %c0_i32 = arith.constant 0 : i32
    %c0_i32_0 = arith.constant 0 : i32
    return %arg0, %1, %c0_i32 : i32, i32, i32
  }
  func.func @transform_1(%arg0: i32, %arg1: i32, %arg2: memref<1xi32, #tpu.memory_space<smem>>, %arg3: memref<1xi32, #tpu.memory_space<smem>>) -> (i32, i32, i32) {
    %0 = arith.index_cast %arg1 : i32 to index
    %1 = memref.load %arg3[%0] : memref<1xi32, #tpu.memory_space<smem>>
    %c0_i32 = arith.constant 0 : i32
    %c0_i32_0 = arith.constant 0 : i32
    return %arg0, %1, %c0_i32 : i32, i32, i32
  }
  func.func @transform_2(%arg0: i32, %arg1: i32, %arg2: memref<1xi32, #tpu.memory_space<smem>>, %arg3: memref<1xi32, #tpu.memory_space<smem>>) -> (i32, i32, i32) {
    %c0_i32 = arith.constant 0 : i32
    %c0_i32_0 = arith.constant 0 : i32
    %c0_i32_1 = arith.constant 0 : i32
    return %arg0, %c0_i32, %c0_i32_0 : i32, i32, i32
  }
}

</mosaic_0001>

<bundles_post_ra>
// kernel: tpu_custom_call.1
= control target key start
LH: loop header
LB: loop body
LE: loop exit
PB: predicated region body
PF: predicated region fallthrough
CT: control target
= control target key end

     0   :  { %s1168_s0 = inlined_call_operand.<no memory space> [shape: s32[1], index: 0, kind: input, shape index: {}]   ;;  %s1169_s1 = inlined_call_operand.<no memory space> [shape: s32[1], index: 1, kind: input, shape index: {}]   ;;  %s1170_s2 = inlined_call_operand.hbm [shape: f32[2,8,32], index: 2, kind: input, shape index: {}]   ;;  %s1171_s3 = inlined_call_operand.hbm [shape: f32[2,8,32], index: 3, kind: input, shape index: {}]   ;;  %s1172_s4 = inlined_call_operand.hbm [shape: f32[2,8,128], index: 4, kind: output, shape index: {}]  }
   0x1   :  { %9 = sst [smem:[#allocation4]] %s1168_s0 }
   0x2   :  { %10 = sst [smem:[#allocation5]] %s1169_s1 }
   0x3   :  { %11 = vsyncpa [#allocation7], 0 }
   0x4   :  { %13 = vsyncpa [#allocation7 + $0x1], 0 }
   0x5   :  { %14 = vsyncpa [#allocation10], 0 }
   0x6   :  { %16 = vsyncpa [#allocation10 + $0x1], 0 }
   0x7   :  { %17 = vsyncpa [#allocation8], 0 }
   0x8   :  { %19 = vsyncpa [#allocation8 + $0x1], 0  ;;  %s854_s19 = smov 0   ;;  %s856_s20 = smov 0  }
   0x9   :  { %s858_s21 = smov 0   ;;  %s860_s22 = smov 0  }
   0xa   :  { %s862_s23 = smov 0   ;;  %s864_s0 = smov 0  }
   0xb   :  { %s866_s24 = smov 0   ;;  %s868_s1 = smov 0  }
   0xc   :  { %s870_s25 = smov 0   ;;  %s872_s26 = smov 0  }
   0xd   :  { %s874_s27 = smov 0   ;;  %s876_s28 = smov 0  }
   0xe LB: > { %1181 = sst [smem:[#allocation15_spill]] %s804_s25  ;;  %s472_s29 = sadd.s32 4294967295, %s816_s28   ;;  %s816_s28 = sphi %s876_s28, %s25_s28   ;;  %s812_s27 = sphi %s874_s27, %s1218_s27   ;;  %s808_s26 = sphi %s872_s26, %s1217_s26   ;;  %s804_s25 = sphi %s870_s25, %s1207_s25   ;;  %s800_s1 = sphi %s868_s1, %s1216_s1   ;;  %s796_s24 = sphi %s866_s24, %s1215_s24   ;;  %s792_s0 = sphi %s864_s0, %s1214_s0   ;;  %s788_s23 = sphi %s862_s23, %s1213_s23   ;;  %s784_s22 = sphi %s860_s22, %s1212_s22   ;;  %s780_s21 = sphi %s858_s21, %s1211_s21   ;;  %s776_s20 = sphi %s856_s20, %s1210_s20   ;;  %s772_s19 = sphi %s854_s19, %s1209_s19  }
   0xf   : > { %s473_s30 = sadd.s32 4294967294, %s816_s28   ;;  %s37_s5 = sadd.s32 1, %s812_s27 }
  0x10   : > { %s41_s6 = sld [smem:[#allocation4]]  ;;  %p39_p0 = scmp.ge.s32.totalorder %s37_s5, 2 }
  0x11   : > { %s48_s7 = sadd.s32 1, %s804_s25  ;;  %p55_p1 = scmp.ne.s32.totalorder %s804_s25, %s800_s1 }
  0x12   : > { %p1175_p2 = scmp.eq.s32.totalorder %s816_s28, 0  ;;  %s1220_s5 = smov (%p39_p0, %s37_s5), 0 }
  0x13   : > { %1182 = sst [smem:[#allocation16_spill]] %s1220_s5  ;;  %p61_p4 = scmp.ne.s32.totalorder %s800_s1, %s796_s24 }
  0x14   : > { %p923_p3 = por %p1175_p2, %p55_p1  ;;  %s43_s9 = ssub.s32 %s812_s27, %s1220_s5 }
  0x15   : > { %p930_p5 = scmp.eq.s32.totalorder %s472_s29, 0  ;;  %s934_s11 = sld [smem:[#allocation5]] }
  0x16   : > { %p942_p7 = scmp.eq.s32.totalorder %s43_s9, 0  ;;  %s104_s14 = sadd.s32 1, %s780_s21 }
  0x17   : > { %s1184_s10 = scalar_select %p930_p5, 1, 0 }
  0x18   : > { %p938_p6 = por %p930_p5, %p61_p4  ;;  %p114_p8 = scmp.ne.s32.totalorder %s780_s21, %s776_s20 }
  0x19   : > { %s952_s15 = scalar_select %p942_p7, %s804_s25, %s48_s7  }
  0x1a   : > { %s1185_s12 = scalar_select %p938_p6, 1, 0 }
  0x1b   : > { %1187 = sst [smem:[#allocation17_spill]] %s952_s15  ;;  %p115_p9 = scmp.eq.s32.totalorder %s472_s29, 1 }
  0x1c   : > { %s957_s16 = scalar_select %p942_p7, %s780_s21, %s104_s14  }
  0x1d   : > { %p120_p10 = scmp.ne.s32.totalorder %s776_s20, %s772_s19  ;;  %p961_p11 = por %p115_p9, %p114_p8 }
  0x1e   : > { %1188 = sst [smem:[#allocation18_spill]] %s957_s16  ;;  %p121_p12 = scmp.eq.s32.totalorder %s473_s30, 1 }
  0x1f   : > { %s1189_s17 = scalar_select %p961_p11, 1, 0 }
  0x20   : > { %p1176_p0 = scmp.lt.s32.totalorder %s816_s28, 2  ;;  %s141_s18 = sand.u32 1, %s804_s25  }
  0x21   : > { %p968_p1 = por %p121_p12, %p120_p10  ;;  %s476_s7 = sshll.u32 %s141_s18, 3 }
  0x22   : > { %s150_s9 = sadd.s32 %s812_s27, %s41_s6  ;;  %s145_s16 = scalar_lea.vmem [#allocation6], %s476_s7 }
  0x23   : > { %s1190_s24 = scalar_select %p968_p1, 1, 0 }
  0x24   : > { %s477_s14 = sshll.u32 %s150_s9, 7  ;;  %s154_s30 = sshll.u32 %s145_s16, 4  ;;  %s978_s30 = int_to_ptr.vmem [resolvable:$true] %s154_s30 }
  0x25   : > { %s976_s15 = scalar_lea.hbm %s1170_s2, %s477_s14  ;;  %p984_p4 = pnand %p1176_p0, %p923_p3 }
  0x26   : > { %s142_s5 = scalar_lea.sflag [#allocation7], %s141_s18  ;;  %s622_s6 = scalar_lea.hbm %s976_s15, 128 }
  0x27   : > { %p623_p10 = scmp.ne.s32.totalorder %s976_s15, %s622_s6  ;;  %p624_p12 = pneg %p984_p4 }
  0x28   : > { %s627_s7 = scalar_lea.hbm %s1170_s2, 256  ;;  %p628_p3 = scmp.lt.u32.totalorder %s976_s15, %s1170_s2 }
  0x29   : > { %p625_p13 = pnand %p624_p12, %p623_p10  ;;  %p629_p0 = scmp.lt.u32.totalorder %s627_s7, %s622_s6 }
  0x2a   : > { %p631_p9 = scmp.lt.u32.totalorder %s622_s6, %s976_s15 }
  0x2b   : > { %p626_p2 = pneg %p625_p13  ;;  %p630_p8 = por %p629_p0, %p628_p3 }
  0x2d   : > { %p632_p1 = por %p631_p9, %p630_p8 }
  0x2f   : > { %p633_p11 = pnand %p632_p1, %p626_p2 }
  0x31   : > { %636 = shalt.err (!%p633_p11)
}
  0x32   : > { %s637_s18 = scalar_lea.vmem %s978_s30, 128  ;;  %s818_s29 = smov [#allocation6]  }
  0x33   : > { %p638_p13 = scmp.ne.s32.totalorder %s978_s30, %s637_s18  ;;  %s642_s16 = sshll.u32 %s818_s29, 4  ;;  %s643_s16 = int_to_ptr.vmem [resolvable:$false] %s642_s16 }
  0x34   : > { %s644_s8 = scalar_lea.vmem %s643_s16, 256  ;;  %p645_p5 = scmp.lt.s32.totalorder %s978_s30, %s643_s16 }
  0x35   : > { %p640_p10 = pnand %p638_p13, %p624_p12  ;;  %p646_p0 = scmp.lt.s32.totalorder %s644_s8, %s637_s18 }
  0x37   : > { %p641_p6 = pneg %p640_p10  ;;  %p647_p3 = por %p646_p0, %p645_p5 }
  0x39   : > { %p648_p8 = pnand %p647_p3, %p641_p6 }
  0x3b   : > { %651 = shalt.err (!%p648_p8)
}
  0x3c   : > { %510 = dma.hbm_to_vmem [thread:$0]  (!%p984_p4), %s976_s15, 128, %s978_s30, %s142_s5  }
  0x3d   : > { %p1192_p2 = scmp.lt.s32.totalorder %s816_s28, 3  ;;  %p1193_p5 = scmp.ge.s32.totalorder %s816_s28, 1 }
  0x3e   : > { %s78_s6 = sadd.s32 1, %s792_s0  ;;  %p85_p11 = scmp.ne.s32.totalorder %s792_s0, %s788_s23 }
  0x3f   : > { %p1019_p6 = pnand %p1193_p5, %p1192_p2  ;;  %p1195_p1 = scmp.eq.s32.totalorder %s816_s28, 0 }
  0x40   : > { %s1029_s7 = scalar_select %p942_p7, %s792_s0, %s78_s6  }
  0x41   : > { %p87_p9 = por %p85_p11, %p1195_p1  ;;  %p91_p12 = scmp.ne.s32.totalorder %s788_s23, %s784_s22 }
  0x42   : > { %s161_s9 = sand.u32 1, %s792_s0   ;;  %s170_s14 = sadd.s32 %s812_s27, %s934_s11 }
  0x43   : > { %p1196_p13 = scmp.ne.s32.totalorder %s1184_s10, 0  ;;  %s478_s15 = sshll.u32 %s161_s9, 3 }
  0x44   : > { %s479_s30 = sshll.u32 %s170_s14, 7  ;;  %s165_s13 = scalar_lea.vmem [#allocation9], %s478_s15 }
  0x45   : > { %p1040_p10 = por %p91_p12, %p1196_p13  ;;  %s1047_s16 = scalar_lea.hbm %s1171_s3, %s479_s30 }
  0x46   : > { %s174_s22 = sshll.u32 %s165_s13, 4  ;;  %p1198_p7 = scmp.lt.s32.totalorder %s816_s28, 2  ;;  %s1055_s22 = int_to_ptr.vmem [resolvable:$true] %s174_s22 }
  0x47   : > { %s1197_s18 = scalar_select %p1040_p10, 1, 0 }
  0x48   : > { %p1051_p4 = pnand %p1198_p7, %p87_p9  ;;  %s162_s11 = scalar_lea.sflag [#allocation10], %s161_s9 }
  0x49   : > { %s652_s8 = scalar_lea.hbm %s1047_s16, 128  ;;  %s657_s15 = scalar_lea.hbm %s1171_s3, 256 }
  0x4a   : > { %p653_p0 = scmp.ne.s32.totalorder %s1047_s16, %s652_s8  ;;  %p654_p3 = pneg %p1051_p4 }
  0x4b   : > { %p658_p5 = scmp.lt.u32.totalorder %s1047_s16, %s1171_s3  ;;  %p659_p11 = scmp.lt.u32.totalorder %s657_s15, %s652_s8 }
  0x4c   : > { %p655_p8 = pnand %p654_p3, %p653_p0  ;;  %p661_p9 = scmp.lt.u32.totalorder %s652_s8, %s1047_s16 }
  0x4d   : > { %p660_p1 = por %p659_p11, %p658_p5 }
  0x4e   : > { %p656_p2 = pneg %p655_p8 }
  0x4f   : > { %p662_p12 = por %p661_p9, %p660_p1 }
  0x51   : > { %p663_p13 = pnand %p662_p12, %p656_p2 }
  0x53   : > { %666 = shalt.err (!%p663_p13)
}
  0x54   : > { %s667_s9 = scalar_lea.vmem %s1055_s22, 128  ;;  %s819_s29 = smov [#allocation9]  }
  0x55   : > { %p668_p7 = scmp.ne.s32.totalorder %s1055_s22, %s667_s9  ;;  %s672_s13 = sshll.u32 %s819_s29, 4  ;;  %s673_s13 = int_to_ptr.vmem [resolvable:$false] %s672_s13 }
  0x56   : > { %s674_s6 = scalar_lea.vmem %s673_s13, 256  ;;  %p675_p10 = scmp.lt.s32.totalorder %s1055_s22, %s673_s13 }
  0x57   : > { %p670_p0 = pnand %p668_p7, %p654_p3  ;;  %p676_p5 = scmp.lt.s32.totalorder %s674_s6, %s667_s9 }
  0x59   : > { %p671_p8 = pneg %p670_p0  ;;  %p677_p11 = por %p676_p5, %p675_p10 }
  0x5b   : > { %p678_p1 = pnand %p677_p11, %p671_p8 }
  0x5d   : > { %681 = shalt.err (!%p678_p1)
}
  0x5e   : > { %513 = dma.hbm_to_vmem [thread:$0]  (!%p1051_p4), %s1047_s16, 128, %s1055_s22, %s162_s11  }
  0x5f   : > { %183 = sbr.rel (%p1019_p6) target bundleno = 595 (0x253), region = 28  ;;  %s185_s8 = sand.u32 (!%p1019_p6), 1, %s800_s1  }
  0x60   : > { %s481_s14 = sshll.u32 (!%p1019_p6), %s185_s8, 3  ;;  %s186_s15 = scalar_lea.sflag (!%p1019_p6), [#allocation7], %s185_s8 }
  0x61   : > { %s189_s30 = scalar_lea.vmem (!%p1019_p6), [#allocation6], %s481_s14  ;;  %p1200_p3 = scmp.ne.s32.totalorder (!%p1019_p6), %s1185_s12, 0 }
  0x66   : > { %759 = dma.done.wait (%p1200_p3), %s186_s15, 128  }
  0x67   : > { %761 = vsyncadd (%p1200_p3), %s186_s15, 4294967168  ;;  %s194_s10 = sand.u32 1, %s788_s23   ;;  %p1201_p10 = scmp.ne.s32.totalorder %s1197_s18, 0 }
  0x68   : > { %s482_s5 = sshll.u32 %s194_s10, 3  ;;  %s195_s9 = scalar_lea.sflag [#allocation10], %s194_s10 }
  0x69   : > { %s198_s16 = scalar_lea.vmem [#allocation9], %s482_s5 }
  0x6a   : > { %763 = dma.done.wait (%p1201_p10), %s195_s9, 128  }
  0x6b   : > { %765 = vsyncadd (%p1201_p10), %s195_s9, 4294967168  ;;  %v820_v0 = vmov 0.0   ;;  %vm821_vm0 = vmmov 0   ;;  %vm236_vm1 = vcmask 261120   ;;  %v235_v1 = vld [vmem:[%s198_s16] sm:$0xff]  ;;  %v234_v2 = vld [vmem:[%s189_s30] sm:$0xff] }
  0x6c   : > { %494 = vmatprep.subr.mxu0 %v820_v0  ;;  %496 = vmatprep.mubr.msk.f32.mxu0 %vm821_vm0, %v820_v0  ;;  %vm232_vm2 = vcmask 64512   ;;  %s226_s12 = sld [smem:[#allocation4]]  ;;  %s221_s22 = sand.u32 1, %s776_s20  }
  0x6d   : > { %495 = vmatpush3.xpose.msk.msra.mxu0 %vm236_vm1, %v235_v1  ;;  %233 = vst.msk [vmem:[#allocation2] sm:$0xff] %vm232_vm2, %v820_v0  ;;  %s227_s25 = sld [smem:[#allocation5]]  ;;  %s483_s11 = sshll.u32 %s221_s22, 3 }
  0x6e   : > { %s489_s8 = sshll.u32 %s808_s26, 7  ;;  %s223_s15 = scalar_lea.vmem [#allocation11], %s483_s11 }
  0x6f   : > { %s369_s30 = sshll.u32 %s223_s15, 4  ;;  %s1102_s16 = scalar_lea.hbm %s1172_s4, %s489_s8  ;;  %s1104_s30 = int_to_ptr.vmem [resolvable:$true] %s369_s30 }
  0x70   : > { %497 = vmatmul.mubr.msk.f32.vlgmr.msra.gmra.mrb[0].mxu0 %vm236_vm1, %v234_v2  ;;  %p1202_p2 = scmp.ne.s32.totalorder %s1189_s17, 0  ;;  %s822_s26 = smov [#allocation11]  }
  0x73   : > { %p325_p6 = scmp.eq.s32.totalorder %s226_s12, %s227_s25  ;;  %s356_s12 = scalar_lea.sflag [#allocation8], %s221_s22 }
  0x74   : > { %v327_v17 = vld [vmem:[#allocation2] sm:$0xff]  ;;  %s682_s25 = scalar_lea.vmem %s1104_s30, 128 }
  0x75   : > { %s326_s18 = scalar_select %p325_p6, 1.0, 2.0 }
  0x76   : > { %p683_p4 = scmp.ne.s32.totalorder %s1104_s30, %s682_s25 }
  0x77   : > { %v328_v15 = vstv %s326_s18  ;;  %s686_s18 = sshll.u32 %s822_s26, 4  ;;  %s687_s18 = int_to_ptr.vmem [resolvable:$false] %s686_s18 }
  0x78   : > { %p684_p9 = pnand %p683_p4, %p1202_p2  ;;  %s688_s11 = scalar_lea.vmem %s687_s18, 256 }
  0x79   : > { %p689_p13 = scmp.lt.s32.totalorder %s1104_s30, %s687_s18  ;;  %p690_p7 = scmp.lt.s32.totalorder %s688_s11, %s682_s25 }
  0x7a   : > { %p685_p12 = pneg %p684_p9 }
  0x7b   : > { %p691_p0 = por %p690_p7, %p689_p13 }
  0x7d   : > { %p692_p8 = pnand %p691_p0, %p685_p12 }
 0x143   : > { %v309_v3 = vpop.f32.mrb[0].mxu0 }
 0x144   : > { %v486_v4 = vadd.f32 -0.2, %v309_v3  ;;  %v498_v5 = vpop.f32.mrb[1].mxu0 }
 0x146   : > { %v314_v6 = vmul.f32 1.442695, %v486_v4 }
 0x148   : > { %618 = vpow2.f32 %v314_v6 }
 0x152   : > { %v619_v7 = vpop.eup %618 }
 0x153   : > { %v316_v8 = vadd.f32 1.0, %v619_v7  ;;  %v319_v9 = vmul.f32 -0.5, %v619_v7  ;;  %v322_v11 = vand.u32 2147483647, %v619_v7 }
 0x155   : > { %620 = vlog2.f32 %v316_v8  ;;  %v320_v10 = vadd.f32 1.0, %v319_v9  ;;  %vm323_vm3 = vcmp.lt.f32.partialorder %v322_v11, 0.0004427343 }
 0x157   : > { %v321_v14 = vmul.f32 %v619_v7, %v320_v10 }
 0x15f   : > { %v621_v12 = vpop.eup %620 }
 0x160   : > { %v318_v13 = vmul.f32 0.6931472, %v621_v12 }
 0x162   : > { %v324_v16 = vsel %vm323_vm3, %v321_v14, %v318_v13 }
 0x163   : > { %v329_v18 = vmul.f32 %v328_v15, %v324_v16 }
 0x165   : > { %v330_v19 = vadd.f32 %v329_v18, %v327_v17 }
 0x167   : > { %332 = vst.msk [vmem:[#allocation2] sm:$0xff] %vm232_vm2, %v330_v19 }
 0x16e   : > { %v336_v20 = vld [vmem:[#allocation2] sm:$0xff] }
 0x16f   : > { %v337_v21 = vsel %vm232_vm2, %v336_v20, 0.0 }
 0x170   : > { %338 = vadd.xlane.f32.xlu0 %v337_v21 }
 0x1fd   : > { %v339_v22 = vpop.xlane.xlu0 %338 }
 0x1fe   : > { %v340_v23 = vrot.slane %v339_v22, 4 }
 0x200   : > { %v341_v24 = vadd.f32 %v340_v23, %v339_v22 }
 0x202   : > { %v342_v25 = vrot.slane %v341_v24, 2 }
 0x204   : > { %v343_v26 = vadd.f32 %v342_v25, %v341_v24 }
 0x206   : > { %v344_v27 = vrot.slane %v343_v26, 1 }
 0x208   : > { %v345_v28 = vadd.f32 %v344_v27, %v343_v26 }
 0x20a   : > { %499 = vpush %v345_v28 }
 0x23b   : > { %s500_s29 = spop %499 }
 0x23c   : > { %s487_s13 = sadd.f32 -9.368805, %s500_s29 }
 0x23e   : > { %s348_s6 = smul.f32 0.5, %s487_s13 }
 0x240   : > { %s351_s14 = smul.f32 0.017857144, %s348_s6 }
 0x242   : > { %s352_s10 = sadd.f32 0.18555033, %s351_s14 }
 0x244   : > { %v353_v29 = vstv %s352_s10 }
 0x245   : > { %354 = vst [vmem:[%s223_s15] sm:$0xff] %v353_v29 }
 0x246   : > { %695 = shalt.err (!%p692_p8)
}
 0x247   : > { %s696_s22 = scalar_lea.hbm %s1102_s16, 128  ;;  %s700_s6 = scalar_lea.hbm %s1172_s4, 256 }
 0x248   : > { %p697_p5 = scmp.ne.s32.totalorder %s1102_s16, %s696_s22  ;;  %p701_p3 = scmp.lt.u32.totalorder %s1102_s16, %s1172_s4 }
 0x249   : > { %p702_p10 = scmp.lt.u32.totalorder %s700_s6, %s696_s22  ;;  %p704_p4 = scmp.lt.u32.totalorder %s696_s22, %s1102_s16 }
 0x24a   : > { %p698_p11 = pnand %p697_p5, %p1202_p2 }
 0x24b   : > { %p703_p6 = por %p702_p10, %p701_p3 }
 0x24c   : > { %p699_p1 = pneg %p698_p11 }
 0x24d   : > { %p705_p9 = por %p704_p4, %p703_p6 }
 0x24f   : > { %p706_p12 = pnand %p705_p9, %p699_p1 }
 0x251   : > { %709 = shalt.err (!%p706_p12)
}
 0x252   : > { %505 = dma.vmem_to_hbm [thread:$0]  (%p1202_p2), %s1104_s30, 128, %s1102_s16, %s356_s12  }
 0x253 PF: > { %s381_s15 = sand.u32 1, %s772_s19   ;;  %p1203_p13 = scmp.ne.s32.totalorder %s1190_s24, 0 }
 0x254   : > { %p1204_p7 = scmp.ge.s32.totalorder %s816_s28, 2  ;;  %s382_s10 = scalar_lea.sflag [#allocation8], %s381_s15 }
 0x256   : > { %p515_p0 = pnand %p1204_p7, %p1203_p13 }
 0x258   : > { %767 = dma.done.wait (!%p515_p0), %s382_s10, 128  }
 0x259   : > { %769 = vsyncadd (!%p515_p0), %s382_s10, 4294967168  ;;  %s25_s28 = sadd.s32 1, %s816_s28   ;;  %s1205_s17 = sld [smem:[#allocation18_spill]] }
 0x25a   : > { %p22_p8 = scmp.ge.s32.totalorder %s25_s28, 4   ;;  %s1206_s30 = sld [smem:[#allocation15_spill]] }
 0x25b   : > { %s1207_s25 = sld [smem:[#allocation17_spill]]  ;;  %s1208_s5 = sld [smem:[#allocation16_spill]] }
 0x25c   : > { %s1209_s19 = smov %s776_s20  ;;  %s1210_s20 = smov %s780_s21 }
 0x25d   : > { %s1212_s22 = smov %s788_s23  ;;  %s1213_s23 = smov %s792_s0 }
 0x25e   : > { %s1214_s0 = smov %s1029_s7  ;;  %s1215_s24 = smov %s800_s1 }
 0x25f   : > { %s1211_s21 = smov %s1205_s17  ;;  %s1217_s26 = smov %s812_s27 }
 0x260   : > { %s1216_s1 = smov %s1206_s30  ;;  %24 = sbr.rel (!%p22_p8) target bundleno = 14 (0xe), region = 94 }
 0x261   : > { %s1218_s27 = smov %s1208_s5 }
 0x267   :  { %387 = vsyncpa [#allocation7], 1 }
 0x268   :  { %389 = vsyncpa [#allocation7 + $0x1], 1 }
 0x269   :  { %390 = vsyncpa [#allocation10], 1 }
 0x26a   :  { %392 = vsyncpa [#allocation10 + $0x1], 1 }
 0x26b   :  { %393 = vsyncpa [#allocation8], 1 }
 0x26c   :  { %395 = vsyncpa [#allocation8 + $0x1], 1 }

</bundles_post_ra>
